<compile_context>
chip_gen: v6e
topology: v6e:2x2x1
jax: 0.10.0
libtpu: 0.0.40
codegen_flags: <defaults>
</compile_context>

<pallas_src>
import jax
import jax.numpy as jnp
from jax.experimental import pallas as pl
from jax.experimental.pallas import tpu as pltpu

D_IN = 512
D_HID = 256
D_OUT = 2
D_MM = 128            # lane-dense N for the second matmul (w2/b2 zero-padded once)
TB_MAX = 512          # max batch-tile rows (512x512 f32 x-tile = 1 MiB/buffer)
MIN_GRID_STEPS = 4    # target >=4 grid steps so v7x's 2 TCs each pipeline >=2


def _round_up(x, m):
    return ((x + m - 1) // m) * m


def classifier_kernel(x_ref, w1_ref, b1_ref, w2_ref, b2_ref, o_ref):
    # Fold the f32 -> bf16 cast into the kernel (x arrives as f32 from HBM).
    x = x_ref[...].astype(jnp.bfloat16)
    # Linear 1: (TB, 512) bf16 @ (512, 256) bf16 -> f32 accumulate, + bias, ReLU.
    h = jnp.dot(x, w1_ref[...], preferred_element_type=jnp.float32)
    h = jnp.maximum(h + b1_ref[...], 0.0)
    # TODO(synk): nn.Dropout(0.5) is stochastic in train mode; eval-mode identity here.
    # Linear 2: (TB, 256) bf16 @ (256, 128 zero-padded) bf16 -> f32, + padded bias.
    out = jnp.dot(h.astype(jnp.bfloat16), w2_ref[...],
                  preferred_element_type=jnp.float32) + b2_ref[...]
    # Store only the 2 real logit columns (narrow masked store; store slot has slack).
    o_ref[...] = out[:, :D_OUT].astype(o_ref.dtype)


def prepare_params(w1, b1, w2, b2):
    """One-time (load-time) parameter prep: bf16 casts, zero-pad of the 2-wide head."""
    w1_bf16 = w1.astype(jnp.bfloat16)
    b1_2d = b1.reshape(1, D_HID).astype(jnp.float32)
    w2_pad = jnp.zeros((D_HID, D_MM), jnp.bfloat16).at[:, :D_OUT].set(
        w2.astype(jnp.bfloat16))
    b2_pad = jnp.zeros((1, D_MM), jnp.float32).at[:, :D_OUT].set(
        b2.reshape(1, D_OUT).astype(jnp.float32))
    return w1_bf16, b1_2d, w2_pad, b2_pad


@jax.jit
def finetune_classifier(features, w1_bf16, b1_2d, w2_pad, b2_pad):
    """features: (B, 512) float32 -> logits (B, 2) float32."""
    B = features.shape[0]

    # Batch tile: ~B/4 rounded to 16 sublanes, capped at TB_MAX; pad B to a tile multiple.
    tb = min(TB_MAX, _round_up(pl.cdiv(B, MIN_GRID_STEPS), 16))
    b_pad = _round_up(B, tb)
    if b_pad != B:
        features = jnp.pad(features, ((0, b_pad - B), (0, 0)))

    grid = (b_pad // tb,)

    cost = pl.CostEstimate(
        flops=2 * b_pad * D_IN * D_HID + 2 * b_pad * D_HID * D_MM,
        transcendentals=0,
        bytes_accessed=(b_pad * D_IN * 4          # x (f32)
                        + D_IN * D_HID * 2        # w1 (bf16)
                        + D_HID * 4               # b1 (f32)
                        + D_HID * D_MM * 2        # w2 padded (bf16)
                        + D_MM * 4                # b2 padded (f32)
                        + b_pad * D_OUT * 4))     # logits out (f32)

    out = pl.pallas_call(
        classifier_kernel,
        out_shape=jax.ShapeDtypeStruct((b_pad, D_OUT), jnp.float32),
        grid=grid,
        in_specs=[
            pl.BlockSpec((tb, D_IN), lambda i: (i, 0)),       # x: tiled over batch
            pl.BlockSpec((D_IN, D_HID), lambda i: (0, 0)),    # w1: VMEM-resident
            pl.BlockSpec((1, D_HID), lambda i: (0, 0)),       # b1
            pl.BlockSpec((D_HID, D_MM), lambda i: (0, 0)),    # w2 (lane-padded, resident)
            pl.BlockSpec((1, D_MM), lambda i: (0, 0)),        # b2 (lane-padded)
        ],
        out_specs=pl.BlockSpec((tb, D_OUT), lambda i: (i, 0)),
        compiler_params=pltpu.CompilerParams(
            dimension_semantics=("parallel",)),
        cost_estimate=cost,
    )(features, w1_bf16, b1_2d, w2_pad, b2_pad)

    # Strip batch padding only (no column slice needed anymore).
    return out[:B]


def init_params(key):
    """Deterministic init mimicking nn.Linear's uniform(-1/sqrt(fan_in), 1/sqrt(fan_in))."""
    k1, k2, k3, k4 = jax.random.split(key, 4)
    bound1 = 1.0 / jnp.sqrt(jnp.float32(D_IN))
    bound2 = 1.0 / jnp.sqrt(jnp.float32(D_HID))
    w1 = jax.random.uniform(k1, (D_IN, D_HID), jnp.float32, -bound1, bound1)
    b1 = jax.random.uniform(k2, (D_HID,), jnp.float32, -bound1, bound1)
    w2 = jax.random.uniform(k3, (D_HID, D_OUT), jnp.float32, -bound2, bound2)
    b2 = jax.random.uniform(k4, (D_OUT,), jnp.float32, -bound2, bound2)
    return w1, b1, w2, b2


if __name__ == "__main__":
    key = jax.random.PRNGKey(0)
    pkey, xkey = jax.random.split(key)
    w1, b1, w2, b2 = init_params(pkey)

    # One-time parameter prep (hoisted out of the per-call path).
    params = prepare_params(w1, b1, w2, b2)
    params = jax.block_until_ready(params)

    # TODO(synk): base_model.get_feat has no definition; features stand in for the
    # vstacked per-image feature vectors (B, 512).
    B = 8
    features = jax.random.normal(xkey, (B, D_IN), jnp.float32)

    out = finetune_classifier(features, *params)
    out = jax.block_until_ready(out)

    # Pure-JAX f32 reference matching the PyTorch head (eval-mode dropout = identity).
    # Intentional precision contract: the kernel runs bf16 on the MXU with f32
    # accumulation, so parity with the f32 head is at the ~1e-2 level.
    h_ref = jnp.maximum(features @ w1 + b1, 0.0)
    ref = h_ref @ w2 + b2

    assert out.shape == (B, D_OUT)
    assert jnp.allclose(out, ref, atol=2e-2, rtol=2e-2), (
        f"max abs err {jnp.max(jnp.abs(out - ref))}")

    print("KERNEL_OK")
</pallas_src>

<mosaic_0001>
module attributes {stable_mosaic.version = 11 : i64} {
  func.func @classifier_kernel(%arg0: i32, %arg1: memref<16x512xf32, #tpu.memory_space<vmem>>, %arg2: memref<512x256xbf16, #tpu.memory_space<vmem>>, %arg3: memref<1x256xf32, #tpu.memory_space<vmem>>, %arg4: memref<256x128xbf16, #tpu.memory_space<vmem>>, %arg5: memref<1x128xf32, #tpu.memory_space<vmem>>, %arg6: memref<16x2xf32, #tpu.memory_space<vmem>>) attributes {dimension_semantics = [#tpu.dimension_semantics<parallel>], iteration_bounds = array<i64: 1>, scalar_prefetch = 0 : i64, scratch_operands = 0 : i64, tpu.core_type = #tpu.core_type<tc>, window_params = [{transform_indices = @transform_0, window_bounds = array<i64: 16, 512>}, {pipeline_mode = #tpu.pipeline_mode<synchronous>, transform_indices = @transform_1, window_bounds = array<i64: 512, 256>}, {pipeline_mode = #tpu.pipeline_mode<synchronous>, transform_indices = @transform_2, window_bounds = array<i64: 1, 256>}, {pipeline_mode = #tpu.pipeline_mode<synchronous>, transform_indices = @transform_3, window_bounds = array<i64: 256, 128>}, {pipeline_mode = #tpu.pipeline_mode<synchronous>, transform_indices = @transform_4, window_bounds = array<i64: 1, 128>}, {transform_indices = @transform_5, window_bounds = array<i64: 16, 2>}]} {
    %c0 = arith.constant 0 : index
    %c0_0 = arith.constant 0 : index
    %0 = vector.load %arg1[%c0, %c0_0] : memref<16x512xf32, #tpu.memory_space<vmem>>, vector<16x512xf32>
    %1 = arith.truncf %0 : vector<16x512xf32> to vector<16x512xbf16>
    %c0_1 = arith.constant 0 : index
    %c0_2 = arith.constant 0 : index
    %2 = vector.load %arg2[%c0_1, %c0_2] : memref<512x256xbf16, #tpu.memory_space<vmem>>, vector<512x256xbf16>
    %cst = arith.constant dense<0.000000e+00> : vector<16x256xf32>
    %3 = tpu.matmul %1, %2, %cst {dimension_numbers = #tpu.dot_dimension_numbers<[1], [0], [0], [1], [0, 0, 1, 1], [], []>} : vector<16x512xbf16>, vector<512x256xbf16>, vector<16x256xf32> -> vector<16x256xf32>
    %c0_3 = arith.constant 0 : index
    %c0_4 = arith.constant 0 : index
    %4 = vector.load %arg3[%c0_3, %c0_4] : memref<1x256xf32, #tpu.memory_space<vmem>>, vector<1x256xf32>
    %5 = vector.broadcast %4 : vector<1x256xf32> to vector<16x256xf32>
    %6 = arith.addf %3, %5 : vector<16x256xf32>
    %cst_5 = arith.constant 0.000000e+00 : f32
    %7 = vector.broadcast %cst_5 : f32 to vector<16x256xf32>
    %8 = arith.maximumf %6, %7 : vector<16x256xf32>
    %9 = arith.truncf %8 : vector<16x256xf32> to vector<16x256xbf16>
    %c0_6 = arith.constant 0 : index
    %c0_7 = arith.constant 0 : index
    %10 = vector.load %arg4[%c0_6, %c0_7] : memref<256x128xbf16, #tpu.memory_space<vmem>>, vector<256x128xbf16>
    %cst_8 = arith.constant dense<0.000000e+00> : vector<16x128xf32>
    %11 = tpu.matmul %9, %10, %cst_8 {dimension_numbers = #tpu.dot_dimension_numbers<[1], [0], [0], [1], [0, 0, 1, 1], [], []>} : vector<16x256xbf16>, vector<256x128xbf16>, vector<16x128xf32> -> vector<16x128xf32>
    %c0_9 = arith.constant 0 : index
    %c0_10 = arith.constant 0 : index
    %12 = vector.load %arg5[%c0_9, %c0_10] : memref<1x128xf32, #tpu.memory_space<vmem>>, vector<1x128xf32>
    %13 = vector.broadcast %12 : vector<1x128xf32> to vector<16x128xf32>
    %14 = arith.addf %11, %13 : vector<16x128xf32>
    %15 = vector.extract_strided_slice %14 {offsets = [0, 0], sizes = [16, 2], strides = [1, 1]} : vector<16x128xf32> to vector<16x2xf32>
    %c0_11 = arith.constant 0 : index
    %c0_12 = arith.constant 0 : index
    %16 = vector.load %arg6[%c0_11, %c0_12] : memref<16x2xf32, #tpu.memory_space<vmem>>, vector<16x2xf32>
    tpu.vector_store %arg6[%c0_11, %c0_12], %15 {strides = array<i32>} : memref<16x2xf32, #tpu.memory_space<vmem>>, vector<16x2xf32>,
    return
  }
  func.func @transform_0(%arg0: i32) -> (i32, i32) {
    %c0_i32 = arith.constant 0 : i32
    %c0_i32_0 = arith.constant 0 : i32
    return %arg0, %c0_i32 : i32, i32
  }
  func.func @transform_1(%arg0: i32) -> (i32, i32) {
    %c0_i32 = arith.constant 0 : i32
    %c0_i32_0 = arith.constant 0 : i32
    %c0_i32_1 = arith.constant 0 : i32
    return %c0_i32, %c0_i32_0 : i32, i32
  }
  func.func @transform_2(%arg0: i32) -> (i32, i32) {
    %c0_i32 = arith.constant 0 : i32
    %c0_i32_0 = arith.constant 0 : i32
    %c0_i32_1 = arith.constant 0 : i32
    return %c0_i32, %c0_i32_0 : i32, i32
  }
  func.func @transform_3(%arg0: i32) -> (i32, i32) {
    %c0_i32 = arith.constant 0 : i32
    %c0_i32_0 = arith.constant 0 : i32
    %c0_i32_1 = arith.constant 0 : i32
    return %c0_i32, %c0_i32_0 : i32, i32
  }
  func.func @transform_4(%arg0: i32) -> (i32, i32) {
    %c0_i32 = arith.constant 0 : i32
    %c0_i32_0 = arith.constant 0 : i32
    %c0_i32_1 = arith.constant 0 : i32
    return %c0_i32, %c0_i32_0 : i32, i32
  }
  func.func @transform_5(%arg0: i32) -> (i32, i32) {
    %c0_i32 = arith.constant 0 : i32
    %c0_i32_0 = arith.constant 0 : i32
    return %arg0, %c0_i32 : i32, i32
  }
}

</mosaic_0001>

<bundles_post_ra>
// kernel: finetune_classifier.1
= control target key start
LH: loop header
LB: loop body
LE: loop exit
PB: predicated region body
PF: predicated region fallthrough
CT: control target
= control target key end

     0   :  { %10 = vsyncpa [#allocation3], 0  ;;  %s1077_s0 = inlined_call_operand.vmem [shape: f32[16,512], index: 0, kind: input, shape index: {}]   ;;  %s1078_s1 = inlined_call_operand.hbm [shape: bf16[512,256], index: 1, kind: input, shape index: {}]   ;;  %s1079_s2 = inlined_call_operand.vmem [shape: f32[1,256], index: 2, kind: input, shape index: {}]   ;;  %s1080_s3 = inlined_call_operand.hbm [shape: bf16[256,128], index: 3, kind: input, shape index: {}]   ;;  %s1081_s4 = inlined_call_operand.vmem [shape: f32[1,128], index: 4, kind: input, shape index: {}]   ;;  %s1082_s5 = inlined_call_operand.vmem [shape: f32[16,2], index: 5, kind: output, shape index: {}]  }
   0x1   :  { %11 = vsyncpa [#allocation5], 0  ;;  %s999_s18 = smov [#allocation2]  }
   0x2   :  { %s19_s19 = sshll.u32 %s999_s18, 4  ;;  %s20_s19 = int_to_ptr.vmem [resolvable:$true] %s19_s19 }
   0x3   :  { %s963_s20 = scalar_lea.vmem %s20_s19, 8192  ;;  %p968_p1 = scmp.lt.s32.totalorder %s20_s19, %s20_s19 }
   0x4   :  { %p964_p0 = scmp.ne.s32.totalorder %s20_s19, %s963_s20  ;;  %p969_p2 = scmp.lt.s32.totalorder %s963_s20, %s963_s20 }
   0x6   :  { %p970_p3 = por %p969_p2, %p968_p1 }
   0x8   :  { %p971_p4 = pnand %p970_p3, %p964_p0 }
   0xa   :  { %974 = shalt.err (!%p971_p4)
}
   0xb   :  { %s1000_s21 = smov 128   ;;  %s1001_s22 = smov 8  }
   0xc   :  { %25 = dma.hbm_to_vmem [thread:$0]  %s1078_s1, 8192, %s20_s19, [#allocation3], %s1000_s21, %s1000_s21, %s1001_s22  }
   0xd   :  { %s1002_s25 = smov [#allocation4]  }
   0xe   :  { %s33_s26 = sshll.u32 %s1002_s25, 4  ;;  %s34_s26 = int_to_ptr.vmem [resolvable:$true] %s33_s26 }
   0xf   :  { %s983_s27 = scalar_lea.vmem %s34_s26, 2048  ;;  %p988_p6 = scmp.lt.s32.totalorder %s34_s26, %s34_s26 }
  0x10   :  { %p984_p5 = scmp.ne.s32.totalorder %s34_s26, %s983_s27  ;;  %p989_p7 = scmp.lt.s32.totalorder %s983_s27, %s983_s27 }
  0x12   :  { %p990_p8 = por %p989_p7, %p988_p6 }
  0x14   :  { %p991_p9 = pnand %p990_p8, %p984_p5 }
  0x16   :  { %994 = shalt.err (!%p991_p9)
}
  0x17   :  { %s1003_s28 = smov 64   ;;  %s1004_s29 = smov 4  }
  0x18   :  { %39 = dma.hbm_to_vmem [thread:$0]  %s1080_s3, 2048, %s34_s26, [#allocation5], %s1003_s28, %s1003_s28, %s1004_s29  }
  0x19   :  { %995 = dma.done.wait [#allocation3], 8192  }
  0x1a   :  { %996 = vsyncadd [#allocation3], 4294959104 }
  0x1b   :  { %997 = dma.done.wait [#allocation5], 2048  }
  0x1c   :  { %998 = vsyncadd [#allocation5], 4294965248  ;;  %v843_v0 = vld [vmem:[#allocation2 + $0x74] ss:$8 sps:$4 sm:$0xff]   ;;  %v847_v2 = vld [vmem:[#allocation2 + $0x70] ss:$8 sps:$4 sm:$0xff]  }
  0x1d   :  { %v845_v1 = vld [vmem:[#allocation2 + $0x174] ss:$8 sps:$4 sm:$0xff]   ;;  %457 = vmatprep.subr.bf16.mxu0 %v843_v0  ;;  %v848_v3 = vld [vmem:[#allocation2 + $0x170] ss:$8 sps:$4 sm:$0xff]   ;;  %v849_v4 = vld [vmem:[#allocation2 + $0x64] ss:$8 sps:$4 sm:$0xff]  }
  0x1e   :  { %500 = vmatprep.subr.bf16.mxu1 %v845_v1  ;;  %458 = vmatpush1.bf16.msra.mxu0 %v847_v2  ;;  %v851_v5 = vld [vmem:[#allocation2 + $0x164] ss:$8 sps:$4 sm:$0xff]   ;;  %v853_v6 = vld [vmem:[#allocation2 + $0x60] ss:$8 sps:$4 sm:$0xff]   ;;  %v855_v8 = vld [vmem:[#allocation2 + $0x54] ss:$8 sps:$4 sm:$0xff]  }
  0x1f   :  { %501 = vmatpush1.bf16.msra.mxu1 %v848_v3  ;;  %459 = vmatprep.subr.bf16.mxu0 %v849_v4  ;;  %v854_v7 = vld [vmem:[#allocation2 + $0x160] ss:$8 sps:$4 sm:$0xff]   ;;  %v857_v9 = vld [vmem:[#allocation2 + $0x154] ss:$8 sps:$4 sm:$0xff]   ;;  %v859_v10 = vld [vmem:[#allocation2 + $0x50] ss:$8 sps:$4 sm:$0xff]  }
  0x20   :  { %502 = vmatprep.subr.bf16.mxu1 %v851_v5  ;;  %v860_v11 = vld [vmem:[#allocation2 + $0x150] ss:$8 sps:$4 sm:$0xff]   ;;  %v861_v12 = vld [vmem:[#allocation2 + $0x44] ss:$8 sps:$4 sm:$0xff]   ;;  %v865_v14 = vld [vmem:[#allocation2 + $0x40] ss:$8 sps:$4 sm:$0xff]  }
  0x21   :  { %v863_v13 = vld [vmem:[#allocation2 + $0x144] ss:$8 sps:$4 sm:$0xff]   ;;  %v866_v15 = vld [vmem:[#allocation2 + $0x140] ss:$8 sps:$4 sm:$0xff]   ;;  %v867_v16 = vld [vmem:[#allocation2 + $0x34] ss:$8 sps:$4 sm:$0xff]  }
  0x22   :  { %460 = vmatpush1.bf16.msra.mxu0 %v853_v6  ;;  %v869_v17 = vld [vmem:[#allocation2 + $0x134] ss:$8 sps:$4 sm:$0xff]   ;;  %v871_v18 = vld [vmem:[#allocation2 + $0x30] ss:$8 sps:$4 sm:$0xff]   ;;  %v873_v20 = vld [vmem:[#allocation2 + $0x24] ss:$8 sps:$4 sm:$0xff]  }
  0x23   :  { %503 = vmatpush1.bf16.msra.mxu1 %v854_v7  ;;  %461 = vmatprep.subr.bf16.mxu0 %v855_v8  ;;  %v872_v19 = vld [vmem:[#allocation2 + $0x130] ss:$8 sps:$4 sm:$0xff]   ;;  %v875_v21 = vld [vmem:[#allocation2 + $0x124] ss:$8 sps:$4 sm:$0xff]   ;;  %v877_v22 = vld [vmem:[#allocation2 + $0x20] ss:$8 sps:$4 sm:$0xff]  }
  0x24   :  { %504 = vmatprep.subr.bf16.mxu1 %v857_v9  ;;  %v878_v23 = vld [vmem:[#allocation2 + $0x120] ss:$8 sps:$4 sm:$0xff]   ;;  %v879_v24 = vld [vmem:[#allocation2 + $0x14] ss:$8 sps:$4 sm:$0xff]   ;;  %v883_v26 = vld [vmem:[#allocation2 + $0x10] ss:$8 sps:$4 sm:$0xff]  }
  0x25   :  { %v881_v25 = vld [vmem:[#allocation2 + $0x114] ss:$8 sps:$4 sm:$0xff]   ;;  %v884_v27 = vld [vmem:[#allocation2 + $0x110] ss:$8 sps:$4 sm:$0xff]   ;;  %v885_v28 = vld [vmem:[#allocation2 + $0x4] ss:$8 sps:$4 sm:$0xff]  }
  0x26   :  { %462 = vmatpush1.bf16.msra.mxu0 %v859_v10  ;;  %v887_v29 = vld [vmem:[#allocation2 + $0x104] ss:$8 sps:$4 sm:$0xff]   ;;  %v889_v30 = vld [vmem:[#allocation2] ss:$8 sps:$4 sm:$0xff]   ;;  %v891_v32 = vld [vmem:[#allocation2 + $0xf4] ss:$8 sps:$4 sm:$0xff]  }
  0x27   :  { %505 = vmatpush1.bf16.msra.mxu1 %v860_v11  ;;  %463 = vmatprep.subr.bf16.mxu0 %v861_v12  ;;  %v890_v31 = vld [vmem:[#allocation2 + $0x100] ss:$8 sps:$4 sm:$0xff]   ;;  %v893_v33 = vld [vmem:[#allocation2 + $0x1f4] ss:$8 sps:$4 sm:$0xff]   ;;  %v895_v34 = vld [vmem:[#allocation2 + $0xf0] ss:$8 sps:$4 sm:$0xff]  }
  0x28   :  { %506 = vmatprep.subr.bf16.mxu1 %v863_v13  ;;  %v896_v35 = vld [vmem:[#allocation2 + $0x1f0] ss:$8 sps:$4 sm:$0xff]   ;;  %v897_v36 = vld [vmem:[#allocation2 + $0xe4] ss:$8 sps:$4 sm:$0xff]   ;;  %v901_v38 = vld [vmem:[#allocation2 + $0xe0] ss:$8 sps:$4 sm:$0xff]  }
  0x29   :  { %v899_v37 = vld [vmem:[#allocation2 + $0x1e4] ss:$8 sps:$4 sm:$0xff]   ;;  %v902_v39 = vld [vmem:[#allocation2 + $0x1e0] ss:$8 sps:$4 sm:$0xff]   ;;  %v903_v40 = vld [vmem:[#allocation2 + $0xd4] ss:$8 sps:$4 sm:$0xff]  }
  0x2a   :  { %464 = vmatpush1.bf16.msra.mxu0 %v865_v14  ;;  %v905_v41 = vld [vmem:[#allocation2 + $0x1d4] ss:$8 sps:$4 sm:$0xff]   ;;  %v907_v42 = vld [vmem:[#allocation2 + $0xd0] ss:$8 sps:$4 sm:$0xff]   ;;  %v909_v44 = vld [vmem:[#allocation2 + $0xc4] ss:$8 sps:$4 sm:$0xff]  }
  0x2b   :  { %507 = vmatpush1.bf16.msra.mxu1 %v866_v15  ;;  %465 = vmatprep.subr.bf16.mxu0 %v867_v16  ;;  %v908_v43 = vld [vmem:[#allocation2 + $0x1d0] ss:$8 sps:$4 sm:$0xff]   ;;  %v911_v45 = vld [vmem:[#allocation2 + $0x1c4] ss:$8 sps:$4 sm:$0xff]   ;;  %v913_v50 = vld [vmem:[#allocation2 + $0xc0] ss:$8 sps:$4 sm:$0xff]  }
  0x2c   :  { %508 = vmatprep.subr.bf16.mxu1 %v869_v17  ;;  %v50_v46 = vld [vmem:[%s1077_s0 + $0x8] sm:$0xff]  ;;  %v52_v48 = vld [vmem:[%s1077_s0 + $0x18] sm:$0xff]  ;;  %v49_v6 = vld [vmem:[%s1077_s0] sm:$0xff]  ;;  %vm725_vm0 = vcmask 15360  }
  0x2d   :  { %v54_v47 = vld [vmem:[%s1077_s0 + $0x28] sm:$0xff]  ;;  %v56_v49 = vld [vmem:[%s1077_s0 + $0x38] sm:$0xff]  ;;  %v53_v7 = vld [vmem:[%s1077_s0 + $0x20] sm:$0xff] }
  0x2e   :  { %466 = vmatpush1.bf16.msra.mxu0 %v871_v18  ;;  %v914_v51 = vld [vmem:[#allocation2 + $0x1c0] ss:$8 sps:$4 sm:$0xff]   ;;  %v915_v52 = vld [vmem:[#allocation2 + $0xb4] ss:$8 sps:$4 sm:$0xff]   ;;  %v58_v53 = vpack.c.bf16 %v54_v47, %v50_v46  ;;  %v60_v54 = vpack.c.bf16 %v56_v49, %v52_v48  ;;  %v919_v56 = vld [vmem:[#allocation2 + $0xb0] ss:$8 sps:$4 sm:$0xff]   ;;  %v57_v11 = vpack.c.bf16 %v53_v7, %v49_v6 }
  0x2f   :  { %509 = vmatpush1.bf16.msra.mxu1 %v872_v19  ;;  %467 = vmatprep.subr.bf16.mxu0 %v873_v20  ;;  %v917_v55 = vld [vmem:[#allocation2 + $0x1b4] ss:$8 sps:$4 sm:$0xff]   ;;  %v920_v57 = vld [vmem:[#allocation2 + $0x1b0] ss:$8 sps:$4 sm:$0xff]   ;;  %v921_v58 = vld [vmem:[#allocation2 + $0xa4] ss:$8 sps:$4 sm:$0xff]  }
  0x30   :  { %510 = vmatprep.subr.bf16.mxu1 %v875_v21  ;;  %489 = vmatprep.mubr.bf16.mxu0 %v58_v53  ;;  %v923_v59 = vld [vmem:[#allocation2 + $0x1a4] ss:$8 sps:$4 sm:$0xff]   ;;  %v925_v60 = vld [vmem:[#allocation2 + $0xa0] ss:$8 sps:$4 sm:$0xff]   ;;  %v927_v62 = vld [vmem:[#allocation2 + $0x94] ss:$8 sps:$4 sm:$0xff]  }
  0x31   :  { %532 = vmatprep.mubr.bf16.mxu1 %v60_v54  ;;  %v926_v61 = vld [vmem:[#allocation2 + $0x1a0] ss:$8 sps:$4 sm:$0xff]   ;;  %v929_v63 = vld [vmem:[#allocation2 + $0x194] ss:$8 sps:$4 sm:$0xff]   ;;  %v931_v0 = vld [vmem:[#allocation2 + $0x90] ss:$8 sps:$4 sm:$0xff]  }
  0x32   :  { %468 = vmatpush1.bf16.msra.mxu0 %v877_v22  ;;  %v932_v1 = vld [vmem:[#allocation2 + $0x190] ss:$8 sps:$4 sm:$0xff]   ;;  %v933_v2 = vld [vmem:[#allocation2 + $0x84] ss:$8 sps:$4 sm:$0xff]   ;;  %v937_v4 = vld [vmem:[#allocation2 + $0x80] ss:$8 sps:$4 sm:$0xff]  }
  0x33   :  { %511 = vmatpush1.bf16.msra.mxu1 %v878_v23  ;;  %469 = vmatprep.subr.bf16.mxu0 %v879_v24  ;;  %v935_v3 = vld [vmem:[#allocation2 + $0x184] ss:$8 sps:$4 sm:$0xff]   ;;  %v938_v5 = vld [vmem:[#allocation2 + $0x180] ss:$8 sps:$4 sm:$0xff]   ;;  %v51_v8 = vld [vmem:[%s1077_s0 + $0x10] sm:$0xff] }
  0x34   :  { %512 = vmatprep.subr.bf16.mxu1 %v881_v25  ;;  %v55_v9 = vld [vmem:[%s1077_s0 + $0x30] sm:$0xff]  ;;  %v939_v10 = vld [vmem:[#allocation4 + $0x78] sm:$0xff]   ;;  %v943_v16 = vld [vmem:[#allocation4 + $0x68] sm:$0xff]  }
  0x35   :  { %v59_v12 = vpack.c.bf16 %v55_v9, %v51_v8  ;;  %v940_v13 = vld [vmem:[#allocation4 + $0x38] sm:$0xff]   ;;  %v941_v14 = vld [vmem:[#allocation4 + $0x70] sm:$0xff]   ;;  %v944_v17 = vld [vmem:[#allocation4 + $0x28] sm:$0xff]  }
  0x36   :  { %470 = vmatpush1.bf16.msra.mxu0 %v883_v26  ;;  %v942_v15 = vld [vmem:[#allocation4 + $0x30] sm:$0xff]   ;;  %v945_v18 = vld [vmem:[#allocation4 + $0x60] sm:$0xff]   ;;  %v947_v20 = vld [vmem:[#allocation4 + $0x58] sm:$0xff]  }
  0x37   :  { %513 = vmatpush1.bf16.msra.mxu1 %v884_v27  ;;  %471 = vmatprep.subr.bf16.mxu0 %v885_v28  ;;  %v946_v19 = vld [vmem:[#allocation4 + $0x20] sm:$0xff]   ;;  %v948_v21 = vld [vmem:[#allocation4 + $0x18] sm:$0xff]   ;;  %v949_v22 = vld [vmem:[#allocation4 + $0x50] sm:$0xff]   ;;  %v127_v28 = vlaneseq }
  0x38   :  { %514 = vmatprep.subr.bf16.mxu1 %v887_v29  ;;  %v950_v23 = vld [vmem:[#allocation4 + $0x10] sm:$0xff]   ;;  %v951_v24 = vld [vmem:[#allocation4 + $0x48] sm:$0xff]   ;;  %v953_v26 = vld [vmem:[#allocation4 + $0x40] sm:$0xff]  }
  0x39   :  { %v952_v25 = vld [vmem:[#allocation4 + $0x8] sm:$0xff]   ;;  %v954_v27 = vld [vmem:[#allocation4] sm:$0xff]   ;;  %v128_v29 = vshrl.u32 %v127_v28, 7 }
  0x3a   :  { %472 = vmatpush1.bf16.msra.mxu0 %v889_v30 }
  0x3b   :  { %515 = vmatpush1.bf16.msra.mxu1 %v890_v31  ;;  %473 = vmatprep.subr.bf16.mxu0 %v891_v32  ;;  %v133_v30 = vsub.s32 1, %v128_v29  ;;  %v129_v31 = vsub.s32 0, %v128_v29  ;;  %v125_v32 = vld [vmem:[%s1079_s2] sm:$0x3] }
  0x3c   :  { %516 = vmatprep.subr.bf16.mxu1 %v893_v33 }
  0x3d   :  { %v134_v33 = vrot.slane %v125_v32, %v133_v30 }
  0x3e   :  { %474 = vmatpush2.bf16.msra.mxu0 %v895_v34  ;;  %v130_v34 = vrot.slane %v125_v32, %v129_v31 }
  0x3f   :  { %517 = vmatpush2.bf16.msra.mxu1 %v896_v35  ;;  %475 = vmatprep.subr.bf16.mxu0 %v897_v36 }
  0x40   :  { %518 = vmatprep.subr.bf16.mxu1 %v899_v37 }
  0x42   :  { %476 = vmatpush2.bf16.msra.mxu0 %v901_v38 }
  0x43   :  { %519 = vmatpush2.bf16.msra.mxu1 %v902_v39  ;;  %477 = vmatprep.subr.bf16.mxu0 %v903_v40 }
  0x44   :  { %520 = vmatprep.subr.bf16.mxu1 %v905_v41 }
  0x46   :  { %478 = vmatpush2.bf16.msra.mxu0 %v907_v42 }
  0x47   :  { %521 = vmatpush2.bf16.msra.mxu1 %v908_v43  ;;  %479 = vmatprep.subr.bf16.mxu0 %v909_v44 }
  0x48   :  { %522 = vmatprep.subr.bf16.mxu1 %v911_v45 }
  0x4a   :  { %480 = vmatpush2.bf16.msra.mxu0 %v913_v50 }
  0x4b   :  { %523 = vmatpush2.bf16.msra.mxu1 %v914_v51  ;;  %481 = vmatprep.subr.bf16.mxu0 %v915_v52 }
  0x4c   :  { %524 = vmatprep.subr.bf16.mxu1 %v917_v55 }
  0x4e   :  { %482 = vmatpush2.bf16.msra.mxu0 %v919_v56 }
  0x4f   :  { %525 = vmatpush2.bf16.msra.mxu1 %v920_v57  ;;  %483 = vmatprep.subr.bf16.mxu0 %v921_v58  ;;  %v798_v58 = vld [vmem:[%s1081_s4] ss:$0 sm:$0xff] }
  0x50   :  { %526 = vmatprep.subr.bf16.mxu1 %v923_v59 }
  0x52   :  { %484 = vmatpush2.bf16.msra.mxu0 %v925_v60 }
  0x53   :  { %527 = vmatpush2.bf16.msra.mxu1 %v926_v61  ;;  %485 = vmatprep.subr.bf16.mxu0 %v927_v62 }
  0x54   :  { %528 = vmatprep.subr.bf16.mxu1 %v929_v63 }
  0x56   :  { %486 = vmatpush2.bf16.msra.mxu0 %v931_v0 }
  0x57   :  { %529 = vmatpush2.bf16.msra.mxu1 %v932_v1  ;;  %487 = vmatprep.subr.bf16.mxu0 %v933_v2 }
  0x58   :  { %530 = vmatprep.subr.bf16.mxu1 %v935_v3 }
  0x5a   :  { %488 = vmatpush2.bf16.msra.mxu0 %v937_v4 }
  0x5b   :  { %531 = vmatpush2.bf16.msra.mxu1 %v938_v5  ;;  %815 = vmatprep.subr.bf16.mxu0 %v939_v10 }
  0x5d   :  { %490 = vmatmul.mubr.bf16.vlgmr.msra.gmra.mxu0 %v57_v11 }
  0x5e   :  { %533 = vmatmul.mubr.bf16.vlgmr.msra.gmra.mxu1 %v59_v12  ;;  %816 = vmatpush3.bf16.msra.mxu0 %v940_v13 }
  0x5f   :  { %817 = vmatprep.subr.bf16.mxu0 %v941_v14 }
  0x62   :  { %818 = vmatpush3.bf16.msra.mxu0 %v942_v15 }
  0x63   :  { %819 = vmatprep.subr.bf16.mxu0 %v943_v16 }
  0x66   :  { %820 = vmatpush3.bf16.msra.mxu0 %v944_v17 }
  0x67   :  { %821 = vmatprep.subr.bf16.mxu0 %v945_v18 }
  0x6a   :  { %822 = vmatpush3.bf16.msra.mxu0 %v946_v19 }
  0x6b   :  { %823 = vmatprep.subr.bf16.mxu0 %v947_v20 }
  0x6e   :  { %824 = vmatpush3.bf16.msra.mxu0 %v948_v21 }
  0x6f   :  { %825 = vmatprep.subr.bf16.mxu0 %v949_v22 }
  0x72   :  { %826 = vmatpush3.bf16.msra.mxu0 %v950_v23 }
  0x73   :  { %827 = vmatprep.subr.bf16.mxu0 %v951_v24 }
  0x76   :  { %828 = vmatpush3.bf16.msra.mxu0 %v952_v25 }
  0x77   :  { %829 = vmatprep.subr.bf16.mxu0 %v953_v26 }
  0x7a   :  { %830 = vmatpush3.bf16.msra.mxu0 %v954_v27 }
 0x11d   :  { %v491_v35 = vpop.f32.mrf.mxu0 }
 0x11e   :  { %v534_v36 = vpop.f32.mrf.mxu1  ;;  %v492_v40 = vadd.f32 %v491_v35, %v130_v34 }
 0x11f   :  { %v493_v37 = vpop.f32.mrf.mxu0 }
 0x120   :  { %v536_v38 = vpop.f32.mrf.mxu1  ;;  %v494_v39 = vadd.f32 %v493_v37, %v134_v33  ;;  %v535_v48 = vadd.f32 %v534_v36, %v492_v40 }
 0x121   :  { %v495_v41 = vpop.f32.mrf.mxu0 }
 0x122   :  { %v538_v42 = vpop.f32.mrf.mxu1  ;;  %v496_v43 = vadd.f32 %v495_v41, %v130_v34  ;;  %v537_v45 = vadd.f32 %v536_v38, %v494_v39  ;;  %v543_v54 = vmax.f32 %v535_v48, 0.0 }
 0x123   :  { %v497_v44 = vpop.f32.mrf.mxu0 }
 0x124   :  { %v539_v46 = vadd.f32 %v538_v42, %v496_v43  ;;  %v498_v47 = vadd.f32 %v497_v44, %v134_v33  ;;  %v540_v49 = vpop.f32.mrf.mxu1  ;;  %v544_v52 = vmax.f32 %v537_v45, 0.0 }
 0x126   :  { %v541_v50 = vadd.f32 %v540_v49, %v498_v47  ;;  %v545_v51 = vmax.f32 %v539_v46, 0.0 }
 0x128   :  { %v546_v53 = vmax.f32 %v541_v50, 0.0  ;;  %v547_v56 = vpack.c.bf16 %v545_v51, %v543_v54 }
 0x12a   :  { %v548_v55 = vpack.c.bf16 %v546_v53, %v544_v52 }
 0x12c   :  { %716 = vmatprep.mubr.bf16.mxu0 %v548_v55 }
 0x12d   :  { %717 = vmatmul.mubr.bf16.vlgmr.msra.gmra.mxu0 %v547_v56 }
 0x1ed   :  { %v831_v57 = vpop.f32.mrf.mxu0 }
 0x1ef   :  { %v832_v59 = vpop.f32.mrf.mxu0 }
 0x1f0   :  { %v833_v60 = vadd.f32 %v832_v59, %v831_v57 }
 0x1f1   :  { %v834_v61 = vpop.f32.mrf.mxu0 }
 0x1f2   :  { %v719_v62 = vadd.f32 %v833_v60, %v798_v58 }
 0x1f3   :  { %v835_v63 = vpop.f32.mrf.mxu0 }
 0x1f4   :  { %726 = vst.msk [vmem:[%s1082_s5] sm:$0xff] %vm725_vm0, %v719_v62  ;;  %v836_v0 = vadd.f32 %v835_v63, %v834_v61 }
 0x1f6   :  { %v722_v1 = vadd.f32 %v836_v0, %v798_v58 }
 0x1f8   :  { %727 = vst.msk [vmem:[%s1082_s5 + $0x8] sm:$0xff] %vm725_vm0, %v722_v1 }
 0x1f9   :  { %732 = vsyncpa [#allocation3], 1 }
 0x1fa   :  { %733 = vsyncpa [#allocation5], 1 }

</bundles_post_ra>
